<compile_context>
chip_gen: v7x
topology: tpu7x:2x2x1
jax: 0.10.0
libtpu: 0.0.40
codegen_flags: <defaults>
</compile_context>

<pallas_src>
import functools
import math

import numpy as np
import jax
import jax.numpy as jnp
from jax.experimental import pallas as pl
from jax.experimental.pallas import tpu as pltpu


# -----------------------------------------------------------------------------
# numerics helpers
# -----------------------------------------------------------------------------
_ERF_NUM = (-2.72614225801306e-10, 2.77068142495902e-08, -2.10102402082508e-06,
            -5.69250639462346e-05, -7.34990630326855e-04, -2.95459980854025e-03,
            -1.60960333262415e-02)
_ERF_DEN = (-1.45660718464996e-05, -2.13374055278905e-04, -1.68282697438203e-03,
            -7.37332916720468e-03, -1.42647390514189e-02)


def _poly(x, coeffs):
    acc = jnp.full_like(x, coeffs[0])
    for c in coeffs[1:]:
        acc = acc * x + c
    return acc


def _erf(x):
    # Eigen/XLA f32 erf rational approximation (mul/add/div/clamp only ->
    # lowers cleanly in Mosaic; matches torch erf to f32 accuracy).
    x = jnp.clip(x, -4.0, 4.0)
    x2 = x * x
    return (x * _poly(x2, _ERF_NUM)) / _poly(x2, _ERF_DEN)


def _erf_fast(x):
    # Kernel variant: the divide goes to the EUP approximate reciprocal slot.
    x = jnp.clip(x, -4.0, 4.0)
    x2 = x * x
    return (x * _poly(x2, _ERF_NUM)) * pl.reciprocal(_poly(x2, _ERF_DEN), approx=True)


def _gelu(x):
    # torch nn.GELU() default == exact (erf) GELU.
    return 0.5 * x * (1.0 + _erf(x * 0.7071067811865476))


def _gelu_fast(x):
    return 0.5 * x * (1.0 + _erf_fast(x * 0.7071067811865476))


def _layernorm(x, g, b, eps=1e-5):
    mu = jnp.mean(x, axis=-1, keepdims=True)
    d = x - mu
    var = jnp.mean(d * d, axis=-1, keepdims=True)
    return d * jax.lax.rsqrt(var + eps) * g + b


# -----------------------------------------------------------------------------
# Pallas kernels
# -----------------------------------------------------------------------------
def _patch_embed_kernel(x_ref, w_ref, b_ref, o_ref):
    """Conv3d(kernel==stride) as one lane-dense matmul over B*N rows + bias."""
    o_ref[...] = (jnp.dot(x_ref[...], w_ref[...],
                          preferred_element_type=jnp.float32) + b_ref[...])


def _encoder_kernel(num_heads,
                    x_ref, pos_ref,
                    ln1g, ln1b, wqkv, wp, bp,
                    ln2g, ln2b, w1, b1, w2, b2,
                    o_ref, res_ref):
    """Depth-fused pre-LN transformer encoder.

    grid = (batch, depth).  The residual stream for the current batch element
    lives in `res_ref` (VMEM scratch) across all layers; the sinusoid pos-embed
    is added once at layer 0.  Weights arrive per-layer via the depth grid axis
    (auto double-buffered).  All matmuls are bf16 x bf16 -> f32 accumulation.
    """
    d = pl.program_id(1)

    @pl.when(d == 0)
    def _():
        res_ref[...] = x_ref[0] + pos_ref[...]

    x = res_ref[...]                                          # (N, C) f32 residual
    C = x.shape[-1]
    hd = C // num_heads

    # ---------------- MHSA ----------------
    h = _layernorm(x, ln1g[0], ln1b[0]).astype(jnp.bfloat16)
    # fused lane-dense QKV projection (scale pre-folded into the q columns)
    qkv = jnp.dot(h, wqkv[0], preferred_element_type=jnp.float32)        # (N, 3C)

    heads_out = []
    for hh in range(num_heads):                               # static per-head loop
        q = qkv[:, hh * hd:(hh + 1) * hd]
        k = qkv[:, C + hh * hd:C + (hh + 1) * hd]
        v = qkv[:, 2 * C + hh * hd:2 * C + (hh + 1) * hd]
        # scores = q @ k^T (contract head dims; avoids explicit transpose)
        s = jax.lax.dot_general(q.astype(jnp.bfloat16), k.astype(jnp.bfloat16),
                                (((1,), (1,)), ((), ())),
                                preferred_element_type=jnp.float32)      # (N, N)
        s = s - jnp.max(s, axis=-1, keepdims=True)
        e = jnp.exp(s)
        # divide -> EUP approximate reciprocal (off the VPU critical path)
        # TODO(synk): at production depth consider exact divide / one Newton step.
        p = e * pl.reciprocal(jnp.sum(e, axis=-1, keepdims=True), approx=True)
        heads_out.append(jnp.dot(p.astype(jnp.bfloat16), v.astype(jnp.bfloat16),
                                 preferred_element_type=jnp.float32))    # (N, hd)

    # single full-K output projection on the lane-concatenated head outputs
    attn = jnp.concatenate(heads_out, axis=-1).astype(jnp.bfloat16)      # (N, C)
    x = x + jnp.dot(attn, wp[0], preferred_element_type=jnp.float32) + bp[0]

    # ---------------- MLP ----------------
    h2 = _layernorm(x, ln2g[0], ln2b[0]).astype(jnp.bfloat16)
    m = jnp.dot(h2, w1[0], preferred_element_type=jnp.float32) + b1[0]
    m = _gelu_fast(m)
    m = jnp.dot(m.astype(jnp.bfloat16), w2[0],
                preferred_element_type=jnp.float32) + b2[0]
    x = x + m

    res_ref[...] = x

    @pl.when(d == pl.num_programs(1) - 1)
    def _():
        o_ref[0] = x


def _pool_norm_head_kernel(x_ref, g_ref, b_ref, w_ref, bh_ref, o_ref):
    """Fused: mean over tokens + fc_norm LayerNorm + head, whole batch at once."""
    pooled = jnp.mean(x_ref[...], axis=1)                     # (B, C)
    h = _layernorm(pooled, g_ref[...], b_ref[...])
    o_ref[...] = (jnp.dot(h.astype(jnp.bfloat16), w_ref[...],
                          preferred_element_type=jnp.float32) + bh_ref[...])


# -----------------------------------------------------------------------------
# pallas_call wrappers
# -----------------------------------------------------------------------------
def patch_embed(xp_bf16, w_pe, b_pe, tm_max=256):
    """xp_bf16: (B*n_patches, K) bf16 -> (B*n_patches, C) f32."""
    M, K = xp_bf16.shape
    C = w_pe.shape[-1]
    tm = M if M <= tm_max else tm_max                 # 128/256-row M tiles at scale
    assert M % tm == 0
    return pl.pallas_call(
        _patch_embed_kernel,
        out_shape=jax.ShapeDtypeStruct((M, C), jnp.float32),
        grid=(M // tm,),
        in_specs=[pl.BlockSpec((tm, K), lambda i: (i, 0)),
                  pl.BlockSpec((K, C), lambda i: (0, 0)),
                  pl.BlockSpec((1, C), lambda i: (0, 0))],
        out_specs=pl.BlockSpec((tm, C), lambda i: (i, 0)),
        compiler_params=pltpu.CompilerParams(dimension_semantics=("parallel",)),
    )(xp_bf16, w_pe, b_pe)


def transformer_encoder(x, pos, params, num_heads):
    """x: (B, N, C) f32, pos: (N, C) f32.  One pallas_call for all layers."""
    B, N, C = x.shape
    D = params['w_qkv'].shape[0]
    wnames = ['ln1_g', 'ln1_b', 'w_qkv', 'w_proj', 'b_proj',
              'ln2_g', 'ln2_b', 'w_fc1', 'b_fc1', 'w_fc2', 'b_fc2']
    weights = [params[n] for n in wnames]             # each stacked: (D, ...)

    def wspec(a):
        return pl.BlockSpec((1,) + a.shape[1:], lambda b, d: (d, 0, 0))

    return pl.pallas_call(
        functools.partial(_encoder_kernel, num_heads),
        out_shape=jax.ShapeDtypeStruct((B, N, C), jnp.float32),
        grid=(B, D),
        in_specs=[pl.BlockSpec((1, N, C), lambda b, d: (b, 0, 0)),
                  pl.BlockSpec((N, C), lambda b, d: (0, 0))]
                 + [wspec(a) for a in weights],
        out_specs=pl.BlockSpec((1, N, C), lambda b, d: (b, 0, 0)),
        scratch_shapes=[pltpu.VMEM((N, C), jnp.float32)],
        compiler_params=pltpu.CompilerParams(
            dimension_semantics=("parallel", "arbitrary")),
    )(x, pos, *weights)


def pool_norm_head(x, g, b, w_head, b_head):
    B, N, C = x.shape
    NC = w_head.shape[-1]
    return pl.pallas_call(
        _pool_norm_head_kernel,
        out_shape=jax.ShapeDtypeStruct((B, NC), jnp.float32),
        grid=(1,),
        in_specs=[pl.BlockSpec((B, N, C), lambda i: (0, 0, 0)),
                  pl.BlockSpec((1, C), lambda i: (0, 0)),
                  pl.BlockSpec((1, C), lambda i: (0, 0)),
                  pl.BlockSpec((C, NC), lambda i: (0, 0)),
                  pl.BlockSpec((1, NC), lambda i: (0, 0))],
        out_specs=pl.BlockSpec((B, NC), lambda i: (0, 0)),
    )(x, g, b, w_head, b_head)


# -----------------------------------------------------------------------------
# model: parameters + forward
# -----------------------------------------------------------------------------
def get_sinusoid_encoding_table(n_position, d_hid):
    def angle_vec(pos):
        return [pos / np.power(10000, 2 * (j // 2) / d_hid) for j in range(d_hid)]
    tab = np.array([angle_vec(p) for p in range(n_position)], dtype=np.float64)
    tab[:, 0::2] = np.sin(tab[:, 0::2])
    tab[:, 1::2] = np.cos(tab[:, 1::2])
    return jnp.asarray(tab[None], dtype=jnp.float32)          # (1, N, C)


def init_params(key, cfg):
    C, H, D = cfg['embed_dim'], cfg['heads'], cfg['depth']
    hd = C // H
    Mh = int(C * cfg['mlp_ratio'])
    K, NC = cfg['patch_dim'], cfg['num_classes']
    scale = hd ** (-0.5)
    keys = iter(jax.random.split(key, 64))

    def xavier(shape, fan_in, fan_out):
        lim = math.sqrt(6.0 / (fan_in + fan_out))
        return jax.random.uniform(next(keys), shape, jnp.float32, -lim, lim)

    def small(shape):
        return 0.02 * jax.random.normal(next(keys), shape, jnp.float32)

    def ln_g(shape):
        return 1.0 + 0.05 * jax.random.normal(next(keys), shape, jnp.float32)

    bf16 = jnp.bfloat16
    # Fused QKV weight, columns [q | k | v] each head-major; fold the attention
    # scale (hd**-0.5 = 2^-3 at hd=64, exact) into the q columns.
    w_qkv = xavier((D, C, 3 * C), C, 3 * C)
    w_qkv = w_qkv.at[:, :, :C].multiply(scale)

    return dict(
        w_pe=xavier((K, C), K, C).astype(bf16), b_pe=small((1, C)),
        ln1_g=ln_g((D, 1, C)), ln1_b=small((D, 1, C)),
        w_qkv=w_qkv.astype(bf16),
        w_proj=xavier((D, C, C), C, C).astype(bf16), b_proj=small((D, 1, C)),
        ln2_g=ln_g((D, 1, C)), ln2_b=small((D, 1, C)),
        w_fc1=xavier((D, C, Mh), C, Mh).astype(bf16), b_fc1=small((D, 1, Mh)),
        w_fc2=xavier((D, Mh, C), Mh, C).astype(bf16), b_fc2=small((D, 1, C)),
        fc_norm_g=ln_g((1, C)), fc_norm_b=small((1, C)),
        w_head=xavier((C, NC), C, NC).astype(bf16), b_head=small((1, NC)))


def _patchify(x, cfg):
    """Im2col equivalent of Conv3d(kernel=stride=(tubelet, p, p)) + flatten(2).T."""
    B, Cc, T, H, W = x.shape
    p, tub = cfg['patch'], cfg['tubelet']
    t_, h_, w_ = T // tub, H // p, W // p
    xp = x.reshape(B, Cc, t_, tub, h_, p, w_, p)
    xp = xp.transpose(0, 2, 4, 6, 1, 3, 5, 7)                 # (B,t',h',w',C,dt,dh,dw)
    return xp.reshape(B, t_ * h_ * w_, Cc * tub * p * p)


def vit_forward(x, params, cfg):
    """Pallas forward.  x: (B, C, T, H, W) f32 -> logits (B, num_classes) f32."""
    C = cfg['embed_dim']
    N = cfg['n_patches']
    B = x.shape[0]

    # patch embed: conv-as-matmul, batch folded into the M dimension
    xp = _patchify(x, cfg).astype(jnp.bfloat16).reshape(B * N, -1)       # (B*N, K)
    tok = patch_embed(xp, params['w_pe'], params['b_pe']).reshape(B, N, C)

    # depth-fused encoder (pos-embed added in-kernel at layer 0)
    # TODO(synk): use_registers / FlashMHA / torch.utils.checkpoint branches of the
    # module are training/config-specific and not taken with default args.
    tok = transformer_encoder(tok, cfg['pos_enc'][0], params, cfg['heads'])

    # norm = Identity (use_mean_pooling=True); fc_norm(mean) + head fused
    return pool_norm_head(tok, params['fc_norm_g'], params['fc_norm_b'],
                          params['w_head'], params['b_head'])


# -----------------------------------------------------------------------------
# pure-JAX reference (same math incl. bf16 operand rounding, exact softmax/erf)
# -----------------------------------------------------------------------------
def vit_reference(x, params, cfg):
    f32 = jnp.float32
    bf16 = jnp.bfloat16
    C, H = cfg['embed_dim'], cfg['heads']
    hd = C // H

    xp = _patchify(x, cfg).astype(bf16)                                   # (B, N, K)
    B, N, _ = xp.shape
    tok = (jnp.einsum('bnk,kc->bnc', xp, params['w_pe'], preferred_element_type=f32)
           + params['b_pe'] + cfg['pos_enc'])

    for i in range(cfg['depth']):
        h = _layernorm(tok, params['ln1_g'][i], params['ln1_b'][i]).astype(bf16)
        qkv = jnp.einsum('bnc,ck->bnk', h, params['w_qkv'][i],
                         preferred_element_type=f32).reshape(B, N, 3, H, hd)
        q, k, v = qkv[:, :, 0], qkv[:, :, 1], qkv[:, :, 2]                # scale folded
        s = jnp.einsum('bqhd,bkhd->bhqk', q.astype(bf16), k.astype(bf16),
                       preferred_element_type=f32)
        p = jax.nn.softmax(s, axis=-1)
        o = jnp.einsum('bhqk,bkhd->bqhd', p.astype(bf16), v.astype(bf16),
                       preferred_element_type=f32).reshape(B, N, C)
        attn = jnp.einsum('bnc,cd->bnd', o.astype(bf16), params['w_proj'][i],
                          preferred_element_type=f32) + params['b_proj'][i]
        tok = tok + attn
        h2 = _layernorm(tok, params['ln2_g'][i], params['ln2_b'][i]).astype(bf16)
        m = jnp.einsum('bnc,ch->bnh', h2, params['w_fc1'][i],
                       preferred_element_type=f32) + params['b_fc1'][i]
        m = _gelu(m)
        m = jnp.einsum('bnh,hc->bnc', m.astype(bf16), params['w_fc2'][i],
                       preferred_element_type=f32) + params['b_fc2'][i]
        tok = tok + m

    pooled = tok.mean(axis=1)
    hh = _layernorm(pooled, params['fc_norm_g'], params['fc_norm_b'])
    return jnp.einsum('bc,ck->bk', hh.astype(bf16), params['w_head'],
                      preferred_element_type=f32) + params['b_head']


# -----------------------------------------------------------------------------
if __name__ == "__main__":
    cfg = dict(img=16, patch=8, frames=4, tubelet=2, in_chans=3,
               embed_dim=128, depth=2, heads=2, mlp_ratio=4.0, num_classes=128)
    cfg['n_patches'] = (cfg['frames'] // cfg['tubelet']) * (cfg['img'] // cfg['patch']) ** 2
    cfg['patch_dim'] = cfg['in_chans'] * cfg['tubelet'] * cfg['patch'] ** 2
    cfg['pos_enc'] = get_sinusoid_encoding_table(cfg['n_patches'], cfg['embed_dim'])

    B = 2
    key = jax.random.PRNGKey(0)
    kx, kp = jax.random.split(key)
    x = jax.random.normal(
        kx, (B, cfg['in_chans'], cfg['frames'], cfg['img'], cfg['img']), jnp.float32)
    params = init_params(kp, cfg)

    out = jax.block_until_ready(vit_forward(x, params, cfg))
    ref = jax.block_until_ready(vit_reference(x, params, cfg))

    assert out.shape == (B, cfg['num_classes'])
    assert np.isfinite(np.asarray(out)).all()
    np.testing.assert_allclose(np.asarray(out), np.asarray(ref), rtol=2e-2, atol=2e-2)
    print("KERNEL_OK")
</pallas_src>

<mosaic_0001>
module attributes {stable_mosaic.version = 11 : i64} {
  func.func @_patch_embed_kernel(%arg0: i32, %arg1: memref<16x384xbf16, #tpu.memory_space<vmem>>, %arg2: memref<384x128xbf16, #tpu.memory_space<vmem>>, %arg3: memref<1x128xf32, #tpu.memory_space<vmem>>, %arg4: memref<16x128xf32, #tpu.memory_space<vmem>>) attributes {dimension_semantics = [#tpu.dimension_semantics<parallel>], iteration_bounds = array<i64: 1>, scalar_prefetch = 0 : i64, scratch_operands = 0 : i64, tpu.core_type = #tpu.core_type<tc>, window_params = [{transform_indices = @transform_0, window_bounds = array<i64: 16, 384>}, {pipeline_mode = #tpu.pipeline_mode<synchronous>, transform_indices = @transform_1, window_bounds = array<i64: 384, 128>}, {pipeline_mode = #tpu.pipeline_mode<synchronous>, transform_indices = @transform_2, window_bounds = array<i64: 1, 128>}, {transform_indices = @transform_3, window_bounds = array<i64: 16, 128>}]} {
    %c0 = arith.constant 0 : index
    %c0_0 = arith.constant 0 : index
    %0 = vector.load %arg1[%c0, %c0_0] : memref<16x384xbf16, #tpu.memory_space<vmem>>, vector<16x384xbf16>
    %c0_1 = arith.constant 0 : index
    %c0_2 = arith.constant 0 : index
    %1 = vector.load %arg2[%c0_1, %c0_2] : memref<384x128xbf16, #tpu.memory_space<vmem>>, vector<384x128xbf16>
    %cst = arith.constant dense<0.000000e+00> : vector<16x128xf32>
    %2 = tpu.matmul %0, %1, %cst {dimension_numbers = #tpu.dot_dimension_numbers<[1], [0], [0], [1], [0, 0, 1, 1], [], []>} : vector<16x384xbf16>, vector<384x128xbf16>, vector<16x128xf32> -> vector<16x128xf32>
    %c0_3 = arith.constant 0 : index
    %c0_4 = arith.constant 0 : index
    %3 = vector.load %arg3[%c0_3, %c0_4] : memref<1x128xf32, #tpu.memory_space<vmem>>, vector<1x128xf32>
    %4 = vector.broadcast %3 : vector<1x128xf32> to vector<16x128xf32>
    %5 = arith.addf %2, %4 : vector<16x128xf32>
    %c0_5 = arith.constant 0 : index
    %c0_6 = arith.constant 0 : index
    %6 = vector.load %arg4[%c0_5, %c0_6] : memref<16x128xf32, #tpu.memory_space<vmem>>, vector<16x128xf32>
    tpu.vector_store %arg4[%c0_5, %c0_6], %5 {strides = array<i32>} : memref<16x128xf32, #tpu.memory_space<vmem>>, vector<16x128xf32>,
    return
  }
  func.func @transform_0(%arg0: i32) -> (i32, i32) {
    %c0_i32 = arith.constant 0 : i32
    %c0_i32_0 = arith.constant 0 : i32
    return %arg0, %c0_i32 : i32, i32
  }
  func.func @transform_1(%arg0: i32) -> (i32, i32) {
    %c0_i32 = arith.constant 0 : i32
    %c0_i32_0 = arith.constant 0 : i32
    %c0_i32_1 = arith.constant 0 : i32
    return %c0_i32, %c0_i32_0 : i32, i32
  }
  func.func @transform_2(%arg0: i32) -> (i32, i32) {
    %c0_i32 = arith.constant 0 : i32
    %c0_i32_0 = arith.constant 0 : i32
    %c0_i32_1 = arith.constant 0 : i32
    return %c0_i32, %c0_i32_0 : i32, i32
  }
  func.func @transform_3(%arg0: i32) -> (i32, i32) {
    %c0_i32 = arith.constant 0 : i32
    %c0_i32_0 = arith.constant 0 : i32
    return %arg0, %c0_i32 : i32, i32
  }
}

</mosaic_0001>

<bundles_post_ra>
// kernel: tpu_custom_call.1
= control target key start
LH: loop header
LB: loop body
LE: loop exit
PB: predicated region body
PF: predicated region fallthrough
CT: control target
= control target key end

     0   :  { %8 = vsyncpa [#allocation3], 0  ;;  %s625_s0 = inlined_call_operand.hbm [shape: bf16[16,384], index: 0, kind: input, shape index: {}]   ;;  %s626_s1 = inlined_call_operand.hbm [shape: bf16[384,128], index: 1, kind: input, shape index: {}]   ;;  %s627_s2 = inlined_call_operand.vmem [shape: f32[1,128], index: 2, kind: input, shape index: {}]   ;;  %s628_s3 = inlined_call_operand.hbm [shape: f32[16,128], index: 3, kind: output, shape index: {}]  }
   0x1   :  { %9 = vsyncpa [#allocation6], 0 }
   0x2   :  { %10 = vsyncpa [#allocation4], 0  ;;  %s555_s12 = smov [#allocation2]   ;;  %s483_s16 = scalar_lea.hbm %s625_s0, 384 }
   0x3   :  { %s16_s13 = sshll.u32 %s555_s12, 4  ;;  %p484_p0 = scmp.ne.s32.totalorder %s625_s0, %s483_s16  ;;  %s17_s13 = int_to_ptr.vmem [resolvable:$true] %s16_s13 }
   0x4   :  { %p487_p1 = scmp.lt.u32.totalorder %s483_s16, %s625_s0 }
   0x6   :  { %p489_p2 = pnand %p487_p1, %p484_p0 }
   0x8   :  { %492 = shalt.err (!%p489_p2)
}
   0x9   :  { %s493_s21 = scalar_lea.vmem %s17_s13, 384  ;;  %p498_p4 = scmp.lt.s32.totalorder %s17_s13, %s17_s13 }
   0xa   :  { %p494_p3 = scmp.ne.s32.totalorder %s17_s13, %s493_s21  ;;  %p499_p5 = scmp.lt.s32.totalorder %s493_s21, %s493_s21 }
   0xc   :  { %p500_p6 = por %p499_p5, %p498_p4 }
   0xe   :  { %p501_p7 = pnand %p500_p6, %p494_p3 }
  0x10   :  { %504 = shalt.err (!%p501_p7)
}
  0x11   :  { %s556_s22 = smov 192   ;;  %s557_s23 = smov 12  }
  0x12   :  { %22 = dma.hbm_to_vmem [thread:$0]  %s625_s0, 384, %s17_s13, [#allocation3], %s556_s22, %s556_s22, %s557_s23  }
  0x13   :  { %s558_s26 = smov [#allocation5]   ;;  %s505_s30 = scalar_lea.hbm %s626_s1, 3072 }
  0x14   :  { %s28_s27 = sshll.u32 %s558_s26, 4  ;;  %p506_p8 = scmp.ne.s32.totalorder %s626_s1, %s505_s30  ;;  %s29_s27 = int_to_ptr.vmem [resolvable:$true] %s28_s27 }
  0x15   :  { %p509_p9 = scmp.lt.u32.totalorder %s505_s30, %s626_s1 }
  0x17   :  { %p511_p10 = pnand %p509_p9, %p506_p8 }
  0x19   :  { %514 = shalt.err (!%p511_p10)
}
  0x1a   :  { %s515_s8 = scalar_lea.vmem %s29_s27, 3072  ;;  %p520_p12 = scmp.lt.s32.totalorder %s29_s27, %s29_s27 }
  0x1b   :  { %p516_p11 = scmp.ne.s32.totalorder %s29_s27, %s515_s8  ;;  %p521_p13 = scmp.lt.s32.totalorder %s515_s8, %s515_s8 }
  0x1d   :  { %p522_p0 = por %p521_p13, %p520_p12 }
  0x1f   :  { %p523_p1 = pnand %p522_p0, %p516_p11 }
  0x21   :  { %526 = shalt.err (!%p523_p1)
}
  0x22   :  { %s559_s0 = smov 64   ;;  %s560_s9 = smov 4  }
  0x23   :  { %34 = dma.hbm_to_vmem [thread:$0]  %s626_s1, 3072, %s29_s27, [#allocation6], %s559_s0, %s559_s0, %s560_s9  }
  0x24   :  { %549 = dma.done.wait [#allocation3], 384  }
  0x25   :  { %550 = vsyncadd [#allocation3], 4294966912 }
  0x26   :  { %551 = dma.done.wait [#allocation6], 3072  }
  0x27   :  { %552 = vsyncadd [#allocation6], 4294964224  ;;  %v561_v0 = vmov 0.0   ;;  %vm562_vm0 = vmmov 0   ;;  %v455_v1 = vld [vmem:[#allocation5 + $0x40] sm:$0xff]   ;;  %v458_v4 = vld [vmem:[#allocation5 + $0x48] sm:$0xff]  }
  0x28   :  { %424 = vmatprep.subr.bf16.mxu1 %v561_v0  ;;  %440 = vmatprep.mubr.msk.bf16.mxu1 %vm562_vm0, %v561_v0  ;;  %v456_v2 = vld [vmem:[#allocation5] sm:$0xff]   ;;  %v459_v5 = vld [vmem:[#allocation5 + $0x8] sm:$0xff]   ;;  %v461_v7 = vld [vmem:[#allocation5 + $0x50] sm:$0xff]   ;;  %s563_s13 = smov [#allocation7]  }
  0x29   :  { %393 = vmatprep.subr.bf16.mxu0 %v455_v1  ;;  %v457_v3 = vld [vmem:[#allocation5 + $0x80] sm:$0xff]   ;;  %v460_v6 = vld [vmem:[#allocation5 + $0x88] sm:$0xff]   ;;  %v462_v8 = vld [vmem:[#allocation5 + $0x10] sm:$0xff]   ;;  %s352_s14 = sshll.u32 %s563_s13, 4  ;;  %s353_s14 = int_to_ptr.vmem [resolvable:$true] %s352_s14 }
  0x2a   :  { %394 = vmatpush3.bf16.msra.mxu0 %v456_v2  ;;  %425 = vmatpush3.bf16.msra.mxu1 %v457_v3  ;;  %v463_v9 = vld [vmem:[#allocation5 + $0x90] sm:$0xff]   ;;  %v464_v10 = vld [vmem:[#allocation5 + $0x58] sm:$0xff]   ;;  %v467_v13 = vld [vmem:[#allocation5 + $0x60] sm:$0xff]   ;;  %s527_s15 = scalar_lea.vmem %s353_s14, 256  ;;  %p532_p3 = scmp.lt.s32.totalorder %s353_s14, %s353_s14 }
  0x2b   :  { %395 = vmatprep.subr.bf16.mxu0 %v458_v4  ;;  %426 = vmatprep.subr.bf16.mxu1 %v561_v0  ;;  %v465_v11 = vld [vmem:[#allocation5 + $0x18] sm:$0xff]   ;;  %v468_v14 = vld [vmem:[#allocation5 + $0x20] sm:$0xff]   ;;  %v470_v16 = vld [vmem:[#allocation5 + $0x68] sm:$0xff]   ;;  %p528_p2 = scmp.ne.s32.totalorder %s353_s14, %s527_s15  ;;  %p533_p4 = scmp.lt.s32.totalorder %s527_s15, %s527_s15 }
  0x2c   :  { %v466_v12 = vld [vmem:[#allocation5 + $0x98] sm:$0xff]   ;;  %v469_v15 = vld [vmem:[#allocation5 + $0xa0] sm:$0xff]   ;;  %v471_v17 = vld [vmem:[#allocation5 + $0x28] sm:$0xff]  }
  0x2d   :  { %v472_v18 = vld [vmem:[#allocation5 + $0xa8] sm:$0xff]   ;;  %v473_v19 = vld [vmem:[#allocation5 + $0x70] sm:$0xff]   ;;  %v476_v22 = vld [vmem:[#allocation5 + $0x78] sm:$0xff]   ;;  %p534_p5 = por %p533_p4, %p532_p3 }
  0x2e   :  { %396 = vmatpush3.bf16.msra.mxu0 %v459_v5  ;;  %427 = vmatpush3.bf16.msra.mxu1 %v460_v6  ;;  %v474_v20 = vld [vmem:[#allocation5 + $0x30] sm:$0xff]   ;;  %v480_v23 = vld [vmem:[#allocation2 + $0x4] ss:$12 sps:$4 sm:$0xff]   ;;  %v365_v30 = vld [vmem:[%s627_s2] ss:$0 sm:$0xff] }
  0x2f   :  { %397 = vmatprep.subr.bf16.mxu0 %v461_v7  ;;  %428 = vmatprep.subr.bf16.mxu1 %v561_v0  ;;  %v475_v21 = vld [vmem:[#allocation5 + $0xb0] sm:$0xff]   ;;  %v477_v24 = vld [vmem:[#allocation5 + $0x38] sm:$0xff]   ;;  %p535_p6 = pnand %p534_p5, %p528_p2 }
  0x30   :  { %295 = vmatprep.mubr.bf16.mxu0 %v480_v23  ;;  %v481_v25 = vld [vmem:[#allocation5 + $0xb8] sm:$0xff]   ;;  %v478_v26 = vld [vmem:[#allocation2] ss:$12 sps:$4 sm:$0xff]  }
  0x31   :  { %v482_v27 = vld [vmem:[#allocation2 + $0x8] ss:$12 sps:$4 sm:$0xff]  }
  0x32   :  { %398 = vmatpush3.bf16.msra.mxu0 %v462_v8  ;;  %429 = vmatpush3.bf16.msra.mxu1 %v463_v9 }
  0x33   :  { %399 = vmatprep.subr.bf16.mxu0 %v464_v10  ;;  %430 = vmatprep.subr.bf16.mxu1 %v561_v0 }
  0x36   :  { %400 = vmatpush3.bf16.msra.mxu0 %v465_v11  ;;  %431 = vmatpush3.bf16.msra.mxu1 %v466_v12 }
  0x37   :  { %401 = vmatprep.subr.bf16.mxu0 %v467_v13  ;;  %432 = vmatprep.subr.bf16.mxu1 %v561_v0 }
  0x3a   :  { %402 = vmatpush3.bf16.msra.mxu0 %v468_v14  ;;  %433 = vmatpush3.bf16.msra.mxu1 %v469_v15 }
  0x3b   :  { %403 = vmatprep.subr.bf16.mxu0 %v470_v16  ;;  %434 = vmatprep.subr.bf16.mxu1 %v561_v0 }
  0x3e   :  { %404 = vmatpush3.bf16.msra.mxu0 %v471_v17  ;;  %435 = vmatpush3.bf16.msra.mxu1 %v472_v18 }
  0x3f   :  { %405 = vmatprep.subr.bf16.mxu0 %v473_v19  ;;  %436 = vmatprep.subr.bf16.mxu1 %v561_v0 }
  0x42   :  { %406 = vmatpush3.bf16.msra.mxu0 %v474_v20  ;;  %437 = vmatpush3.bf16.msra.mxu1 %v475_v21 }
  0x43   :  { %407 = vmatprep.subr.bf16.mxu0 %v476_v22  ;;  %438 = vmatprep.subr.bf16.mxu1 %v561_v0 }
  0x46   :  { %408 = vmatpush3.bf16.msra.mxu0 %v477_v24  ;;  %439 = vmatpush3.bf16.msra.mxu1 %v481_v25 }
  0x49   :  { %296 = vmatmul.mubr.bf16.vlgmr.msra.gmra.mrb[0].mxu0 %v478_v26  ;;  %441 = vmatmul.mubr.bf16.vlgmr.msra.gmra.mrb[0].mxu1 %v482_v27 }
 0x11c   :  { %v409_v28 = vpop.f32.mrb[0].mxu0  ;;  %v338_v31 = vpop.f32.mrb[0].mxu1 }
 0x11d   :  { %v410_v29 = vpop.f32.mrb[1].mxu0  ;;  %v442_v34 = vpop.f32.mrb[1].mxu1 }
 0x11e   :  { %v411_v32 = vadd.f32 %v410_v29, %v409_v28  ;;  %v412_v33 = vpop.f32.mrb[2].mxu0  ;;  %v341_v36 = vpop.f32.mrb[2].mxu1 }
 0x11f   :  { %v413_v35 = vpop.f32.mrb[3].mxu0  ;;  %v443_v39 = vpop.f32.mrb[3].mxu1 }
 0x120   :  { %v298_v37 = vadd.f32 %v411_v32, %v365_v30  ;;  %v414_v38 = vadd.f32 %v413_v35, %v412_v33 }
 0x122   :  { %v339_v40 = vadd.f32 %v338_v31, %v298_v37  ;;  %v301_v41 = vadd.f32 %v414_v38, %v365_v30 }
 0x124   :  { %345 = vst [vmem:[#allocation7] sm:$0xff] %v339_v40  ;;  %v342_v42 = vadd.f32 %v341_v36, %v301_v41 }
 0x126   :  { %346 = vst [vmem:[#allocation7 + $0x8] sm:$0xff] %v342_v42 }
 0x127   :  { %538 = shalt.err (!%p535_p6)
}
 0x128   :  { %s539_s17 = scalar_lea.hbm %s628_s3, 256 }
 0x129   :  { %p540_p7 = scmp.ne.s32.totalorder %s628_s3, %s539_s17  ;;  %p543_p8 = scmp.lt.u32.totalorder %s539_s17, %s628_s3 }
 0x12b   :  { %p545_p9 = pnand %p543_p8, %p540_p7 }
 0x12d   :  { %548 = shalt.err (!%p545_p9)
}
 0x12e   :  { %s564_s22 = smov 128   ;;  %s565_s23 = smov 8  }
 0x12f   :  { %358 = dma.vmem_to_hbm [thread:$0]  %s353_s14, 256, %s628_s3, [#allocation4], %s564_s22, %s564_s22, %s565_s23  }
 0x130   :  { %553 = dma.done.wait [#allocation4], 256  }
 0x131   :  { %554 = vsyncadd [#allocation4], 4294967040 }
 0x132   :  { %362 = vsyncpa [#allocation3], 1 }
 0x133   :  { %363 = vsyncpa [#allocation6], 1 }
 0x134   :  { %364 = vsyncpa [#allocation4], 1 }

</bundles_post_ra>
